<compile_context>
chip_gen: v7x
topology: tpu7x:2x2x1
jax: 0.10.0
libtpu: 0.0.40
codegen_flags: <defaults>
</compile_context>

<pallas_src>
import math
import functools

import jax
import jax.numpy as jnp
from jax import lax
from jax.experimental import pallas as pl
from jax.experimental.pallas import tpu as pltpu


def attn_pooling_kernel(x_ref, w1_ref, w2_ref, o_ref, *, eps, batch_block):
    # x_ref : (Bb, din, T)  channels-first block (native module layout)
    # w1_ref: (dh, din)     first attention projection (resident)
    # w2_ref: (1, dh)       second attention projection (resident, f32)
    # o_ref : (Bb, 2, din)  row 0 = mean, row 1 = stddev (lane-dense on din)
    w1 = w1_ref[...]
    w2 = w2_ref[...]

    # Small static batch loop (unrolled) -> one grid step handles Bb batch elements.
    for b in range(batch_block):
        x_b = x_ref[b]                                               # (din, T)

        # h = relu(w1 @ x_b) : (dh, T), MXU with f32 accumulation.
        h = jnp.maximum(
            jnp.dot(w1, x_b, preferred_element_type=jnp.float32), 0.0)

        # logits = w2 @ h : (1, T)  -> softmax over time, lane-dense.
        logits = jnp.dot(w2, h, preferred_element_type=jnp.float32)  # (1, T)
        m = jnp.max(logits, axis=1, keepdims=True)
        e = jnp.exp(logits - m)
        attn = e / jnp.sum(e, axis=1, keepdims=True)                 # (1, T) f32
        attn_c = attn.astype(x_b.dtype)

        # Weighted moments over T: contract the last dim of both operands
        # (standard attn @ x^T MXU pattern); results are lane-dense on din.
        dn = (((1,), (1,)), ((), ()))
        mean = lax.dot_general(attn_c, x_b, dn,
                               preferred_element_type=jnp.float32)   # (1, din)
        ex2 = lax.dot_general(attn_c, x_b * x_b, dn,
                              preferred_element_type=jnp.float32)    # (1, din)

        # var = E[x^2] - mean^2, clamped exactly like the PyTorch mask trick.
        var = ex2 - mean * mean
        var = jnp.where(var <= eps, jnp.asarray(eps, var.dtype), var)
        std = jnp.sqrt(var)

        # Two direct stores (no concatenate temp).
        o_ref[b, 0:1, :] = mean.astype(o_ref.dtype)
        o_ref[b, 1:2, :] = std.astype(o_ref.dtype)


def _pick_batch_block(B, max_bb=8):
    """Largest divisor of B that is <= max_bb, preferring >= 2 grid steps."""
    divisors = [d for d in range(1, min(B, max_bb) + 1) if B % d == 0]
    bb = divisors[-1]
    if B // bb < 2:
        for d in reversed(divisors):
            if B // d >= 2:
                bb = d
                break
    return bb


def attn_pooling(x, w1, w2, eps=1e-12, *, compute_dtype=None, batch_block=None):
    """x: (B, din, T); returns (B, 2*din) = concat([mean, stddev], -1)."""
    B, din, T = x.shape
    dh = w1.shape[0]
    out_dtype = x.dtype

    # Optional bf16 input/weight cast (memory-bound kernel); accumulation stays f32.
    if compute_dtype is not None:
        x = x.astype(compute_dtype)
    w1 = w1.astype(x.dtype)
    w2 = w2.astype(jnp.float32)   # tiny; matches the f32 `h` it multiplies

    Bb = batch_block or _pick_batch_block(B)
    assert B % Bb == 0, (B, Bb)

    # Rough VMEM budget: double-buffered blocks + per-iteration temporaries.
    item = jnp.dtype(x.dtype).itemsize
    x_block = Bb * din * T * item
    w_bytes = dh * din * item + dh * 4
    out_block = Bb * 2 * din * 4
    temps = Bb * (dh * T * 4 + din * T * item)
    needed = 2 * x_block + 2 * w_bytes + 2 * out_block + temps
    vmem_limit = None
    if needed > 24 * 2 ** 20:
        # Raise the scoped-VMEM limit (with headroom) for non-toy T*din; for sizes
        # that approach v7x's 64 MiB the right fix is a T-tiled online-softmax
        # variant rather than a bigger slab.
        vmem_limit = int(min(needed * 1.3, 100 * 2 ** 20))

    out = pl.pallas_call(
        functools.partial(attn_pooling_kernel, eps=eps, batch_block=Bb),
        out_shape=jax.ShapeDtypeStruct((B, 2, din), out_dtype),
        grid_spec=pltpu.PrefetchScalarGridSpec(
            num_scalar_prefetch=0,
            grid=(B // Bb,),
            in_specs=[
                pl.BlockSpec((Bb, din, T), lambda i: (i, 0, 0)),   # x, native layout
                pl.BlockSpec((dh, din), lambda i: (0, 0)),         # w1, resident
                pl.BlockSpec((1, dh), lambda i: (0, 0)),           # w2, resident
            ],
            out_specs=pl.BlockSpec((Bb, 2, din), lambda i: (i, 0, 0)),
        ),
        compiler_params=pltpu.CompilerParams(
            dimension_semantics=("parallel",),
            vmem_limit_bytes=vmem_limit),
    )(x, w1, w2)

    # (B, 2, din) -> (B, 2*din); row-major reshape == cat((mean, std), dim=-1)
    return out.reshape(B, 2 * din)


def attn_pooling_ref(x, w1, w2, eps=1e-12):
    """Pure-JAX reference of the PyTorch forward (x: (B, din, T), dim=2)."""
    xt = jnp.transpose(x, (0, 2, 1))                       # (B, T, din)
    h = jax.nn.relu(jnp.einsum("btd,hd->bth", xt, w1))     # (B, T, dh)
    logits = jnp.einsum("bth,oh->bto", h, w2)              # (B, T, 1)
    attn = jax.nn.softmax(logits, axis=1)                  # (B, T, 1)
    mean = jnp.einsum("bdt,bto->bdo", x, attn)             # (B, din, 1)
    var = jnp.einsum("bdt,bto->bdo", (x - mean) ** 2, attn)
    mean = mean[..., 0]
    var = var[..., 0]
    mask = (var <= eps).astype(var.dtype)
    var = (1.0 - mask) * var + mask * eps
    return jnp.concatenate([mean, jnp.sqrt(var)], axis=-1)


if __name__ == "__main__":
    B, din, T, dh = 4, 32, 16, 64
    eps = 1e-12

    key = jax.random.PRNGKey(0)
    kx, k1, k2 = jax.random.split(key, 3)

    # Deterministic param init matching kaiming_uniform_(a=sqrt(5)): bound = 1/sqrt(fan_in)
    b1 = 1.0 / math.sqrt(din)
    b2 = 1.0 / math.sqrt(dh)
    w1 = jax.random.uniform(k1, (dh, din), jnp.float32, minval=-b1, maxval=b1)
    w2 = jax.random.uniform(k2, (1, dh), jnp.float32, minval=-b2, maxval=b2)

    x = jax.random.normal(kx, (B, din, T), jnp.float32)

    out = attn_pooling(x, w1, w2, eps=eps)
    out = jax.block_until_ready(out)

    ref = attn_pooling_ref(x, w1, w2, eps=eps)
    assert out.shape == (B, 2 * din), out.shape
    err = float(jnp.max(jnp.abs(out - ref)))
    assert jnp.allclose(out, ref, atol=1e-5, rtol=1e-5), err

    print("KERNEL_OK")
</pallas_src>

<mosaic_0001>
module attributes {stable_mosaic.version = 11 : i64} {
  func.func @attn_pooling_kernel(%arg0: i32, %arg1: memref<2x32x16xf32, #tpu.memory_space<vmem>>, %arg2: memref<64x32xf32, #tpu.memory_space<vmem>>, %arg3: memref<1x64xf32, #tpu.memory_space<vmem>>, %arg4: memref<2x2x32xf32, #tpu.memory_space<vmem>>) attributes {dimension_semantics = [#tpu.dimension_semantics<parallel>], iteration_bounds = array<i64: 2>, scalar_prefetch = 0 : i64, scratch_operands = 0 : i64, tpu.core_type = #tpu.core_type<tc>, window_params = [{transform_indices = @transform_0, window_bounds = array<i64: 2, 32, 16>}, {pipeline_mode = #tpu.pipeline_mode<synchronous>, transform_indices = @transform_1, window_bounds = array<i64: 64, 32>}, {pipeline_mode = #tpu.pipeline_mode<synchronous>, transform_indices = @transform_2, window_bounds = array<i64: 1, 64>}, {transform_indices = @transform_3, window_bounds = array<i64: 2, 2, 32>}]} {
    %c0 = arith.constant 0 : index
    %c0_0 = arith.constant 0 : index
    %0 = vector.load %arg2[%c0, %c0_0] : memref<64x32xf32, #tpu.memory_space<vmem>>, vector<64x32xf32>
    %c0_1 = arith.constant 0 : index
    %c0_2 = arith.constant 0 : index
    %1 = vector.load %arg3[%c0_1, %c0_2] : memref<1x64xf32, #tpu.memory_space<vmem>>, vector<1x64xf32>
    %c0_3 = arith.constant 0 : index
    %c0_4 = arith.constant 0 : index
    %c0_5 = arith.constant 0 : index
    %2 = vector.load %arg1[%c0_3, %c0_4, %c0_5] : memref<2x32x16xf32, #tpu.memory_space<vmem>>, vector<1x32x16xf32>
    %3 = vector.shape_cast %2 : vector<1x32x16xf32> to vector<32x16xf32>
    %cst = arith.constant dense<0.000000e+00> : vector<64x16xf32>
    %4 = tpu.matmul %0, %3, %cst {dimension_numbers = #tpu.dot_dimension_numbers<[1], [0], [0], [1], [0, 0, 1, 1], [], []>} : vector<64x32xf32>, vector<32x16xf32>, vector<64x16xf32> -> vector<64x16xf32>
    %cst_6 = arith.constant 0.000000e+00 : f32
    %5 = vector.broadcast %cst_6 : f32 to vector<64x16xf32>
    %6 = arith.maximumf %4, %5 : vector<64x16xf32>
    %cst_7 = arith.constant dense<0.000000e+00> : vector<1x16xf32>
    %7 = tpu.matmul %1, %6, %cst_7 {dimension_numbers = #tpu.dot_dimension_numbers<[1], [0], [0], [1], [0, 0, 1, 1], [], []>} : vector<1x64xf32>, vector<64x16xf32>, vector<1x16xf32> -> vector<1x16xf32>
    %cst_8 = arith.constant dense<0xFF800000> : vector<1xf32>
    %8 = vector.multi_reduction <maximumf>, %7, %cst_8 [1] : vector<1x16xf32> to vector<1xf32>
    %9 = vector.shape_cast %8 : vector<1xf32> to vector<1x1xf32>
    %10 = vector.broadcast %9 : vector<1x1xf32> to vector<1x16xf32>
    %11 = arith.subf %7, %10 : vector<1x16xf32>
    %12 = math.exp %11 : vector<1x16xf32>
    %cst_9 = arith.constant dense<0.000000e+00> : vector<1xf32>
    %13 = vector.multi_reduction <add>, %12, %cst_9 [1] : vector<1x16xf32> to vector<1xf32>
    %14 = vector.shape_cast %13 : vector<1xf32> to vector<1x1xf32>
    %15 = vector.broadcast %14 : vector<1x1xf32> to vector<1x16xf32>
    %16 = arith.divf %12, %15 : vector<1x16xf32>
    %cst_10 = arith.constant dense<0.000000e+00> : vector<1x32xf32>
    %17 = tpu.matmul %16, %3, %cst_10 {dimension_numbers = #tpu.dot_dimension_numbers<[1], [1], [0], [0], [0, 0, 1, 0], [], []>} : vector<1x16xf32>, vector<32x16xf32>, vector<1x32xf32> -> vector<1x32xf32>
    %18 = arith.mulf %3, %3 : vector<32x16xf32>
    %cst_11 = arith.constant dense<0.000000e+00> : vector<1x32xf32>
    %19 = tpu.matmul %16, %18, %cst_11 {dimension_numbers = #tpu.dot_dimension_numbers<[1], [1], [0], [0], [0, 0, 1, 0], [], []>} : vector<1x16xf32>, vector<32x16xf32>, vector<1x32xf32> -> vector<1x32xf32>
    %20 = arith.mulf %17, %17 : vector<1x32xf32>
    %21 = arith.subf %19, %20 : vector<1x32xf32>
    %cst_12 = arith.constant 9.99999996E-13 : f32
    %22 = vector.broadcast %cst_12 : f32 to vector<1x32xf32>
    %23 = arith.cmpf ole, %21, %22 : vector<1x32xf32>
    %cst_13 = arith.constant 9.99999996E-13 : f32
    %24 = vector.broadcast %cst_13 : f32 to vector<1x32xf32>
    %25 = arith.select %23, %24, %21 : vector<1x32xi1>, vector<1x32xf32>
    %26 = math.sqrt %25 : vector<1x32xf32>
    %c0_14 = arith.constant 0 : index
    %c0_15 = arith.constant 0 : index
    %c0_16 = arith.constant 0 : index
    %27 = vector.load %arg4[%c0_14, %c0_15, %c0_16] : memref<2x2x32xf32, #tpu.memory_space<vmem>>, vector<1x1x32xf32>
    %28 = vector.shape_cast %27 : vector<1x1x32xf32> to vector<1x32xf32>
    %29 = vector.shape_cast %17 : vector<1x32xf32> to vector<1x1x32xf32>
    tpu.vector_store %arg4[%c0_14, %c0_15, %c0_16], %29 {strides = array<i32>} : memref<2x2x32xf32, #tpu.memory_space<vmem>>, vector<1x1x32xf32>,
    %c0_17 = arith.constant 0 : index
    %c1 = arith.constant 1 : index
    %c0_18 = arith.constant 0 : index
    %30 = vector.load %arg4[%c0_17, %c1, %c0_18] : memref<2x2x32xf32, #tpu.memory_space<vmem>>, vector<1x1x32xf32>
    %31 = vector.shape_cast %30 : vector<1x1x32xf32> to vector<1x32xf32>
    %32 = vector.shape_cast %26 : vector<1x32xf32> to vector<1x1x32xf32>
    tpu.vector_store %arg4[%c0_17, %c1, %c0_18], %32 {strides = array<i32>} : memref<2x2x32xf32, #tpu.memory_space<vmem>>, vector<1x1x32xf32>,
    %c1_19 = arith.constant 1 : index
    %c0_20 = arith.constant 0 : index
    %c0_21 = arith.constant 0 : index
    %33 = vector.load %arg1[%c1_19, %c0_20, %c0_21] : memref<2x32x16xf32, #tpu.memory_space<vmem>>, vector<1x32x16xf32>
    %34 = vector.shape_cast %33 : vector<1x32x16xf32> to vector<32x16xf32>
    %cst_22 = arith.constant dense<0.000000e+00> : vector<64x16xf32>
    %35 = tpu.matmul %0, %34, %cst_22 {dimension_numbers = #tpu.dot_dimension_numbers<[1], [0], [0], [1], [0, 0, 1, 1], [], []>} : vector<64x32xf32>, vector<32x16xf32>, vector<64x16xf32> -> vector<64x16xf32>
    %cst_23 = arith.constant 0.000000e+00 : f32
    %36 = vector.broadcast %cst_23 : f32 to vector<64x16xf32>
    %37 = arith.maximumf %35, %36 : vector<64x16xf32>
    %cst_24 = arith.constant dense<0.000000e+00> : vector<1x16xf32>
    %38 = tpu.matmul %1, %37, %cst_24 {dimension_numbers = #tpu.dot_dimension_numbers<[1], [0], [0], [1], [0, 0, 1, 1], [], []>} : vector<1x64xf32>, vector<64x16xf32>, vector<1x16xf32> -> vector<1x16xf32>
    %cst_25 = arith.constant dense<0xFF800000> : vector<1xf32>
    %39 = vector.multi_reduction <maximumf>, %38, %cst_25 [1] : vector<1x16xf32> to vector<1xf32>
    %40 = vector.shape_cast %39 : vector<1xf32> to vector<1x1xf32>
    %41 = vector.broadcast %40 : vector<1x1xf32> to vector<1x16xf32>
    %42 = arith.subf %38, %41 : vector<1x16xf32>
    %43 = math.exp %42 : vector<1x16xf32>
    %cst_26 = arith.constant dense<0.000000e+00> : vector<1xf32>
    %44 = vector.multi_reduction <add>, %43, %cst_26 [1] : vector<1x16xf32> to vector<1xf32>
    %45 = vector.shape_cast %44 : vector<1xf32> to vector<1x1xf32>
    %46 = vector.broadcast %45 : vector<1x1xf32> to vector<1x16xf32>
    %47 = arith.divf %43, %46 : vector<1x16xf32>
    %cst_27 = arith.constant dense<0.000000e+00> : vector<1x32xf32>
    %48 = tpu.matmul %47, %34, %cst_27 {dimension_numbers = #tpu.dot_dimension_numbers<[1], [1], [0], [0], [0, 0, 1, 0], [], []>} : vector<1x16xf32>, vector<32x16xf32>, vector<1x32xf32> -> vector<1x32xf32>
    %49 = arith.mulf %34, %34 : vector<32x16xf32>
    %cst_28 = arith.constant dense<0.000000e+00> : vector<1x32xf32>
    %50 = tpu.matmul %47, %49, %cst_28 {dimension_numbers = #tpu.dot_dimension_numbers<[1], [1], [0], [0], [0, 0, 1, 0], [], []>} : vector<1x16xf32>, vector<32x16xf32>, vector<1x32xf32> -> vector<1x32xf32>
    %51 = arith.mulf %48, %48 : vector<1x32xf32>
    %52 = arith.subf %50, %51 : vector<1x32xf32>
    %cst_29 = arith.constant 9.99999996E-13 : f32
    %53 = vector.broadcast %cst_29 : f32 to vector<1x32xf32>
    %54 = arith.cmpf ole, %52, %53 : vector<1x32xf32>
    %cst_30 = arith.constant 9.99999996E-13 : f32
    %55 = vector.broadcast %cst_30 : f32 to vector<1x32xf32>
    %56 = arith.select %54, %55, %52 : vector<1x32xi1>, vector<1x32xf32>
    %57 = math.sqrt %56 : vector<1x32xf32>
    %c1_31 = arith.constant 1 : index
    %c0_32 = arith.constant 0 : index
    %c0_33 = arith.constant 0 : index
    %58 = vector.load %arg4[%c1_31, %c0_32, %c0_33] : memref<2x2x32xf32, #tpu.memory_space<vmem>>, vector<1x1x32xf32>
    %59 = vector.shape_cast %58 : vector<1x1x32xf32> to vector<1x32xf32>
    %60 = vector.shape_cast %48 : vector<1x32xf32> to vector<1x1x32xf32>
    tpu.vector_store %arg4[%c1_31, %c0_32, %c0_33], %60 {strides = array<i32>} : memref<2x2x32xf32, #tpu.memory_space<vmem>>, vector<1x1x32xf32>,
    %c1_34 = arith.constant 1 : index
    %c1_35 = arith.constant 1 : index
    %c0_36 = arith.constant 0 : index
    %61 = vector.load %arg4[%c1_34, %c1_35, %c0_36] : memref<2x2x32xf32, #tpu.memory_space<vmem>>, vector<1x1x32xf32>
    %62 = vector.shape_cast %61 : vector<1x1x32xf32> to vector<1x32xf32>
    %63 = vector.shape_cast %57 : vector<1x32xf32> to vector<1x1x32xf32>
    tpu.vector_store %arg4[%c1_34, %c1_35, %c0_36], %63 {strides = array<i32>} : memref<2x2x32xf32, #tpu.memory_space<vmem>>, vector<1x1x32xf32>,
    return
  }
  func.func @transform_0(%arg0: i32) -> (i32, i32, i32) {
    %c0_i32 = arith.constant 0 : i32
    %c0_i32_0 = arith.constant 0 : i32
    %c0_i32_1 = arith.constant 0 : i32
    return %arg0, %c0_i32, %c0_i32_0 : i32, i32, i32
  }
  func.func @transform_1(%arg0: i32) -> (i32, i32) {
    %c0_i32 = arith.constant 0 : i32
    %c0_i32_0 = arith.constant 0 : i32
    %c0_i32_1 = arith.constant 0 : i32
    return %c0_i32, %c0_i32_0 : i32, i32
  }
  func.func @transform_2(%arg0: i32) -> (i32, i32) {
    %c0_i32 = arith.constant 0 : i32
    %c0_i32_0 = arith.constant 0 : i32
    %c0_i32_1 = arith.constant 0 : i32
    return %c0_i32, %c0_i32_0 : i32, i32
  }
  func.func @transform_3(%arg0: i32) -> (i32, i32, i32) {
    %c0_i32 = arith.constant 0 : i32
    %c0_i32_0 = arith.constant 0 : i32
    %c0_i32_1 = arith.constant 0 : i32
    return %arg0, %c0_i32, %c0_i32_0 : i32, i32, i32
  }
}

</mosaic_0001>

<bundles_post_ra>
// kernel: tpu_custom_call.1
= control target key start
LH: loop header
LB: loop body
LE: loop exit
PB: predicated region body
PF: predicated region fallthrough
CT: control target
= control target key end

     0   :  { %8 = vsyncpa [#allocation3], 0  ;;  %s1831_s0 = inlined_call_operand.vmem [shape: f32[4,32,16], index: 0, kind: input, shape index: {}]   ;;  %s1832_s1 = inlined_call_operand.vmem [shape: f32[64,32], index: 1, kind: input, shape index: {}]   ;;  %s1833_s2 = inlined_call_operand.vmem [shape: f32[1,64], index: 2, kind: input, shape index: {}]   ;;  %s1834_s3 = inlined_call_operand.hbm [shape: f32[4,2,32], index: 3, kind: output, shape index: {}]  }
   0x1   :  { %10 = vsyncpa [#allocation3 + $0x1], 0  ;;  %s1519_s12 = smov 0   ;;  %s1521_s13 = smov 0  }
   0x2   :  { %s1523_s14 = smov 0   ;;  %s1525_s15 = smov 0  }
   0x3 LB: > { %s1540_s16 = sadd.s32 4294967295, %s1491_s15   ;;  %s1058_s17 = sadd.s32 4294967294, %s1491_s15   ;;  %s1491_s15 = sphi %s1525_s15, %s1842_s15   ;;  %s1487_s14 = sphi %s1523_s14, %s1841_s14   ;;  %s1483_s13 = sphi %s1521_s13, %s1840_s13   ;;  %s1479_s12 = sphi %s1519_s12, %s1839_s12  }
   0x4   : > { %s1544_s18 = sadd.s32 1, %s1491_s15   ;;  %s91_s19 = sadd.s32 1, %s1487_s14 }
   0x5   : > { %s88_s20 = ssub.s32 %s1491_s15, %s1544_s18  ;;  %p101_p0 = scmp.ne.s32.totalorder %s1487_s14, %s1483_s13 }
   0x6   : > { %p89_p1 = scmp.eq.s32.totalorder %s88_s20, 0  ;;  %p102_p2 = scmp.eq.s32.totalorder %s1540_s16, 1 }
   0x7   : > { %p107_p3 = scmp.ne.s32.totalorder %s1483_s13, %s1479_s12  ;;  %p108_p4 = scmp.eq.s32.totalorder %s1058_s17, 1 }
   0x8   : > { %s1555_s21 = scalar_select %p89_p1, %s1487_s14, %s91_s19  }
   0x9   : > { %p1557_p5 = por %p102_p2, %p101_p0  ;;  %p1561_p6 = por %p108_p4, %p107_p3 }
   0xa   : > { %p1061_p7 = scmp.ge.s32.totalorder %s1491_s15, 1  ;;  %p142_p8 = scmp.lt.s32.totalorder %s1491_s15, 3 }
   0xc   : > { %p143_p9 = pnand %p1061_p7, %p142_p8 }
   0xd   : > { %s1063_s24 = sshll.u32 (!%p143_p9), %s1540_s16, 1  ;;  %v1571_v0 = vld [vmem:[%s1832_s1] sm:$0xff] (!%p143_p9)  ;;  %vm188_vm0 = vcmask (!%p143_p9), 261120   ;;  %v1607_v13 = vld [vmem:[%s1832_s1 + $0x8] sm:$0xff] (!%p143_p9)  ;;  %v1612_v14 = vld [vmem:[%s1832_s1 + $0x10] sm:$0xff] (!%p143_p9)  ;;  %v1493_v20 = vmov (!%p143_p9), 0.0|0.0  }
   0xe   : > { %146 = sbr.rel (%p143_p9) target bundleno = 1807 (0x70f), region = 32  ;;  %p168_p10 = scmp.lt.s32.totalorder (!%p143_p9), %s1063_s24, 3  ;;  %1187 = vmatprep.mubr.msk.f32.mxu1 (!%p143_p9), %vm188_vm0, %v1571_v0  ;;  %v1621_v15 = vld [vmem:[%s1832_s1 + $0x18] sm:$0xff] (!%p143_p9)  ;;  %v1626_v16 = vld [vmem:[%s1832_s1 + $0x20] sm:$0xff] (!%p143_p9)  ;;  %v1635_v17 = vld [vmem:[%s1832_s1 + $0x28] sm:$0xff] (!%p143_p9)  ;;  %1321 = vmatprep.subr.bf16.mxu0 (!%p143_p9), %v1493_v20  ;;  %vm1494_vm1 = vmmov (!%p143_p9), 0  }
   0xf   : > { %v1640_v18 = vld [vmem:[%s1832_s1 + $0x30] sm:$0xff] (!%p143_p9)  ;;  %v1649_v19 = vld [vmem:[%s1832_s1 + $0x38] sm:$0xff] (!%p143_p9)  ;;  %v1495_v21 = vmov (!%p143_p9), 0.0   ;;  %v1665_v42 = vld [vmem:[%s1833_s2] sm:$0x1] (!%p143_p9)  ;;  %vm326_vm2 = vcmask (!%p143_p9), 523264  }
  0x10   : > { %1226 = vmatprep.mubr.msk.f32.mxu0 (!%p143_p9), %vm1494_vm1, %v1495_v21  ;;  %vm400_vm3 = vcmask (!%p143_p9), 122880   ;;  %vm412_vm4 = vcmask (!%p143_p9), 130048   ;;  %s164_s29 = sand.u32 (!%p143_p9), 1, %s1483_s13   ;;  %vm595_vm6 = vcmask (!%p143_p9), 253952   ;;  %s1116_s6 = sshll.u32 (!%p143_p9), %s1540_s16, 6 }
  0x11   : > { %vm1675_vm5 = vmpackc.low (!%p143_p9), %vm412_vm4, %vm412_vm4  ;;  %s1784_s9 = scalar_lea.hbm (!%p143_p9), %s1834_s3, %s1116_s6  ;;  %s1790_s16 = scalar_lea.sflag (!%p143_p9), [#allocation3], %s164_s29 }
  0x12   : > { %s1496_s11 = smov (!%p143_p9), [#allocation2]  }
  0x13   : > { %s1433_s17 = sshll.u32 (!%p143_p9), %s1496_s11, 4  ;;  %s1434_s17 = int_to_ptr.vmem [resolvable:$false] %s1433_s17 }
  0x14   : > { %s1435_s19 = scalar_lea.vmem (!%p143_p9), %s1434_s17, 128 }
  0x15   : > { %s1844_s24 = smov (!%p168_p10, %s1063_s24), 3 }
  0x16   : > { %s1115_s27 = sshll.u32 %s1844_s24, 5 }
  0x17   : > { %s1578_s30 = scalar_lea.vmem %s1831_s0, %s1115_s27 }
  0x18   : > { %v184_v1 = vld [vmem:[%s1578_s30] sm:$0xff]  ;;  %v185_v2 = vld [vmem:[%s1578_s30 + $0x8] sm:$0xff]  ;;  %v186_v3 = vld [vmem:[%s1578_s30 + $0x10] sm:$0xff] }
  0x19   : > { %v1583_v4 = vpack.c.bf16 %v185_v2, %v184_v1  ;;  %v1585_v5 = vmul.f32 %v184_v1, %v184_v1  ;;  %v1587_v6 = vmul.f32 %v185_v2, %v185_v2  ;;  %v187_v7 = vld [vmem:[%s1578_s30 + $0x18] sm:$0xff]  ;;  %v1590_v8 = vmul.f32 %v186_v3, %v186_v3  ;;  %v1085_v52 = vld [vmem:[%s1578_s30 + $0x20] sm:$0xff]  ;;  %v1086_v53 = vld [vmem:[%s1578_s30 + $0x28] sm:$0xff] }
  0x1a   : > { %v1592_v9 = vpack.c.bf16 %v187_v7, %v186_v3  ;;  %v1594_v10 = vmul.f32 %v187_v7, %v187_v7  ;;  %v1337_v54 = vpack.c.bf16 %v1086_v53, %v1085_v52  ;;  %v1701_v55 = vmul.f32 %v1085_v52, %v1085_v52  ;;  %v1087_v58 = vld [vmem:[%s1578_s30 + $0x30] sm:$0xff]  ;;  %v1088_v59 = vld [vmem:[%s1578_s30 + $0x38] sm:$0xff]  ;;  %s1062_s30 = sshll.u32 %s164_s29, 2 }
  0x1b   : > { %1302 = vmatprep.subr.bf16.mxu1 %v1583_v4  ;;  %v1330_v11 = vpack.c.bf16 %v1587_v6, %v1585_v5  ;;  %1324 = vmatpush3.bf16.xpose.msk.msra.mxu0 %vm1675_vm5, %v1583_v4  ;;  %v1703_v56 = vmul.f32 %v1086_v53, %v1086_v53  ;;  %v1709_v60 = vmul.f32 %v1087_v58, %v1087_v58  ;;  %s1746_s4 = scalar_lea.vmem [#allocation2], %s1062_s30 }
  0x1c   : > { %1304 = vmatpush3.bf16.msra.mxu1 %v1583_v4  ;;  %v1334_v12 = vpack.c.bf16 %v1594_v10, %v1590_v8  ;;  %1325 = vmatprep.subr.bf16.mxu0 %v1493_v20  ;;  %v1711_v61 = vmul.f32 %v1088_v59, %v1088_v59  ;;  %v1341_v3 = vpack.c.bf16 %v1088_v59, %v1087_v58  ;;  %s996_s5 = sshll.u32 %s1746_s4, 4  ;;  %s1779_s5 = int_to_ptr.vmem [resolvable:$true] %s996_s5 }
  0x1d   : > { %1306 = vmatprep.subr.bf16.mxu1 %v1592_v9  ;;  %v1366_v57 = vpack.c.bf16 %v1703_v56, %v1701_v55  ;;  %s1429_s10 = scalar_lea.vmem %s1779_s5, 64  ;;  %p1436_p0 = scmp.lt.s32.totalorder %s1779_s5, %s1434_s17 }
  0x1e   : > { %v1370_v62 = vpack.c.bf16 %v1711_v61, %v1709_v60  ;;  %p1430_p11 = scmp.ne.s32.totalorder %s1779_s5, %s1429_s10  ;;  %p1437_p1 = scmp.lt.s32.totalorder %s1435_s19, %s1429_s10 }
  0x20   : > { %1308 = vmatpush3.bf16.msra.mxu1 %v1592_v9  ;;  %p1431_p12 = pnand %p1430_p11, %p1557_p5  ;;  %p1438_p2 = por %p1437_p1, %p1436_p0 }
  0x21   : > { %1309 = vmatprep.subr.bf16.mxu1 %v1493_v20 }
  0x22   : > { %p1432_p13 = pneg %p1431_p12 }
  0x23   : > { %1188 = vmatmul.mubr.msk.f32.vlgmr.msra.gmra.mrb[0].mxu1 %vm188_vm0, %v1607_v13  ;;  %1328 = vmatpush3.bf16.xpose.msk.msra.mxu0 %vm1675_vm5, %v1592_v9 }
  0x24   : > { %1190 = vmatprep.mubr.msk.f32.mxu1 %vm188_vm0, %v1612_v14  ;;  %1338 = vmatprep.subr.bf16.mxu0 %v1337_v54  ;;  %p1439_p3 = pnand %p1438_p2, %p1432_p13 }
  0x27   : > { %1191 = vmatmul.mubr.msk.f32.gmra.mrb[2].mxu1 %vm188_vm0, %v1621_v15 }
  0x28   : > { %1193 = vmatprep.mubr.msk.f32.mxu1 %vm188_vm0, %v1626_v16 }
  0x2b   : > { %1194 = vmatmul.mubr.msk.f32.gmra.mrb[4].mxu1 %vm188_vm0, %v1635_v17 }
  0x2c   : > { %1196 = vmatprep.mubr.msk.f32.mxu1 %vm188_vm0, %v1640_v18 }
  0x2f   : > { %1197 = vmatmul.mubr.msk.f32.gmra.mrb[6].mxu1 %vm188_vm0, %v1649_v19 }
  0x30   : > { %1215 = vmatprep.mubr.msk.f32.mxu1 %vm1494_vm1, %v1495_v21 }
  0xf6   : > { %v1189_v22 = vpop.f32.mrb[0].mxu1 }
  0xf7   : > { %v319_v23 = vmax.f32 %v1189_v22, 0.0  ;;  %v279_v24 = vpop.f32.mrb[1].mxu1 }
  0xf8   : > { %v318_v25 = vmax.f32 %v279_v24, 0.0 }
  0xfa   : > { %v1310_v26 = vpack.c.bf16 %v319_v23, %v318_v25  ;;  %v1192_v27 = vpop.f32.mrb[2].mxu1 }
  0xfb   : > { %v321_v28 = vmax.f32 %v1192_v27, 0.0  ;;  %v289_v29 = vpop.f32.mrb[3].mxu1 }
  0xfc   : > { %v320_v30 = vmax.f32 %v289_v29, 0.0  ;;  %1311 = vmatpush3.bf16.msra.mxu1 %v1310_v26 }
  0xfd   : > { %1312 = vmatprep.subr.bf16.mxu1 %v1493_v20 }
  0xfe   : > { %v1313_v31 = vpack.c.bf16 %v321_v28, %v320_v30  ;;  %v1195_v32 = vpop.f32.mrb[4].mxu1 }
  0xff   : > { %v323_v33 = vmax.f32 %v1195_v32, 0.0  ;;  %v299_v34 = vpop.f32.mrb[5].mxu1 }
 0x100   : > { %v322_v35 = vmax.f32 %v299_v34, 0.0  ;;  %1314 = vmatpush3.bf16.msra.mxu1 %v1313_v31 }
 0x101   : > { %1315 = vmatprep.subr.bf16.mxu1 %v1493_v20 }
 0x102   : > { %v1316_v36 = vpack.c.bf16 %v323_v33, %v322_v35  ;;  %v1198_v37 = vpop.f32.mrb[6].mxu1 }
 0x103   : > { %v325_v38 = vmax.f32 %v1198_v37, 0.0  ;;  %v309_v39 = vpop.f32.mrb[7].mxu1 }
 0x104   : > { %v324_v40 = vmax.f32 %v309_v39, 0.0  ;;  %1317 = vmatpush3.bf16.msra.mxu1 %v1316_v36 }
 0x105   : > { %1318 = vmatprep.subr.bf16.mxu1 %v1493_v20 }
 0x106   : > { %v1319_v41 = vpack.c.bf16 %v325_v38, %v324_v40 }
 0x108   : > { %1320 = vmatpush3.bf16.msra.mxu1 %v1319_v41 }
 0x109   : > { %1329 = vmatprep.subr.bf16.mxu1 %v1493_v20 }
 0x10b   : > { %1216 = vmatmul.mubr.msk.f32.vlgmr.msra.gmra.mrb[8].mxu1 %vm326_vm2, %v1665_v42 }
 0x10c   : > { %1237 = vmatprep.mubr.msk.f32.mxu1 %vm1494_vm1, %v1495_v21 }
 0x111   : > { %1332 = vmatpush3.bf16.xpose.msk.msra.mxu1 %vm1675_vm5, %v1330_v11 }
 0x112   : > { %1333 = vmatprep.subr.bf16.mxu1 %v1493_v20 }
 0x119   : > { %1336 = vmatpush3.bf16.xpose.msk.msra.mxu1 %vm1675_vm5, %v1334_v12 }
 0x11a   : > { %1357 = vmatprep.subr.bf16.mxu1 %v1493_v20 }
 0x1de   : > { %v396_v43 = vpop.f32.mrb[8].mxu1 }
 0x1df   : > { %v1217_v44 = vpop.f32.mrb[9].mxu1  ;;  %v401_v45 = vsel %vm400_vm3, %v396_v43, -inf }
 0x1e0   : > { %402 = vmax.xlane.f32.xlu0 %v401_v45 }
 0x26d   : > { %v403_v47 = vpop.xlane.xlu0 %402 }
 0x26e   : > { %v404_v48 = vsub.f32 %v396_v43, %v403_v47 }
 0x270   : > { %v405_v49 = vmul.f32 1.442695, %v404_v48 }
 0x272   : > { %1417 = vpow2.f32 %v405_v49 }
 0x27c   : > { %v1418_v50 = vpop.eup %1417 }
 0x27d   : > { %v407_v51 = vsel %vm400_vm3, %v1418_v50, 0.0 }
 0x27e   : > { %408 = vadd.xlane.f32.xlu0 %v407_v51 }
 0x30b   : > { %v409_v63 = vpop.xlane.xlu0 %408 }
 0x30c   : > { %1419 = vrcp.f32 %v409_v63 }
 0x316   : > { %v1420_v1 = vpop.eup %1419 }
 0x317   : > { %v411_v2 = vmul.f32 %v1420_v1, %v1418_v50 }
 0x319   : > { %1227 = vmatmul.mubr.msk.f32.vlgmr.msra.gmra.mrb[0].mxu0 %vm412_vm4, %v411_v2  ;;  %1238 = vmatmul.mubr.msk.f32.vlgmr.msra.gmra.mrb[10].mxu1 %vm412_vm4, %v411_v2 }
 0x31a   : > { %1340 = vmatpush3.bf16.msra.mxu0 %v1337_v54  ;;  %1248 = vmatprep.mubr.msk.f32.mxu0 %vm188_vm0, %v1571_v0 }
 0x31b   : > { %1342 = vmatprep.subr.bf16.mxu0 %v1341_v3  ;;  %1360 = vmatpush3.bf16.xpose.msk.msra.mxu1 %vm1675_vm5, %v1337_v54 }
 0x31c   : > { %1361 = vmatprep.subr.bf16.mxu1 %v1493_v20  ;;  %1287 = vmatprep.mubr.msk.f32.mxu1 %vm1494_vm1, %v1495_v21 }
 0x31e   : > { %1344 = vmatpush3.bf16.msra.mxu0 %v1341_v3 }
 0x31f   : > { %1345 = vmatprep.subr.bf16.mxu0 %v1493_v20 }
 0x321   : > { %1249 = vmatmul.mubr.msk.f32.vlgmr.msra.gmra.mrb[2].mxu0 %vm188_vm0, %v1607_v13 }
 0x322   : > { %1251 = vmatprep.mubr.msk.f32.mxu0 %vm188_vm0, %v1612_v14 }
 0x323   : > { %1364 = vmatpush3.bf16.xpose.msk.msra.mxu1 %vm1675_vm5, %v1341_v3 }
 0x325   : > { %1252 = vmatmul.mubr.msk.f32.gmra.mrb[4].mxu0 %vm188_vm0, %v1621_v15 }
 0x326   : > { %1254 = vmatprep.mubr.msk.f32.mxu0 %vm188_vm0, %v1626_v16 }
 0x329   : > { %1255 = vmatmul.mubr.msk.f32.gmra.mrb[6].mxu0 %vm188_vm0, %v1635_v17 }
 0x32a   : > { %1257 = vmatprep.mubr.msk.f32.mxu0 %vm188_vm0, %v1640_v18 }
 0x32d   : > { %1258 = vmatmul.mubr.msk.f32.gmra.mrb[8].mxu0 %vm188_vm0, %v1649_v19 }
 0x32e   : > { %1276 = vmatprep.mubr.msk.f32.mxu0 %vm1494_vm1, %v1495_v21 }
 0x3ec   : > { %v494_v0 = vpop.f32.mrb[0].mxu0  ;;  %v580_v4 = vpop.f32.mrb[10].mxu1 }
 0x3ed   : > { %v584_v5 = vmul.f32 %v494_v0, %v494_v0  ;;  %596 = vst.msk [vmem:[%s1746_s4] sm:$0x1] %vm595_vm6, %v494_v0  ;;  %v1228_v6 = vpop.f32.mrb[1].mxu0  ;;  %v1239_v7 = vpop.f32.mrb[11].mxu1 }
 0x3ef   : > { %v585_v8 = vsub.f32 %v580_v4, %v584_v5 }
 0x3f1   : > { %vm586_vm7 = vcmp.le.f32.partialorder %v585_v8, 1e-12 }
 0x3f2   : > { %v587_v9 = vsel %vm586_vm7, 1e-12, %v585_v8 }
 0x3f3   : > { %1421 = vrsqrt.f32 %v587_v9  ;;  %vm590_vm8 = vcmp.eq.f32.partialorder %v587_v9, inf  ;;  %v593_v28 = vand.u32 2147483648, %v587_v9  ;;  %vm592_vm9 = vcmp.eq.f32.partialorder %v587_v9, 0.0 }
 0x3f4   : > { %v1250_v10 = vpop.f32.mrb[2].mxu0 }
 0x3f5   : > { %v709_v11 = vmax.f32 %v1250_v10, 0.0  ;;  %v669_v12 = vpop.f32.mrb[3].mxu0 }
 0x3f6   : > { %v708_v13 = vmax.f32 %v669_v12, 0.0 }
 0x3f8   : > { %v1346_v14 = vpack.c.bf16 %v709_v11, %v708_v13  ;;  %v1253_v15 = vpop.f32.mrb[4].mxu0 }
 0x3f9   : > { %v711_v16 = vmax.f32 %v1253_v15, 0.0  ;;  %v679_v17 = vpop.f32.mrb[5].mxu0 }
 0x3fa   : > { %v710_v18 = vmax.f32 %v679_v17, 0.0  ;;  %1347 = vmatpush3.bf16.msra.mxu0 %v1346_v14 }
 0x3fb   : > { %1348 = vmatprep.subr.bf16.mxu0 %v1493_v20 }
 0x3fc   : > { %v1349_v19 = vpack.c.bf16 %v711_v16, %v710_v18  ;;  %v1256_v22 = vpop.f32.mrb[6].mxu0 }
 0x3fd   : > { %v1422_v23 = vpop.eup %1421  ;;  %v713_v24 = vmax.f32 %v1256_v22, 0.0  ;;  %v689_v25 = vpop.f32.mrb[7].mxu0 }
 0x3fe   : > { %v589_v26 = vmul.f32 %v1422_v23, %v587_v9  ;;  %v712_v27 = vmax.f32 %v689_v25, 0.0  ;;  %1350 = vmatpush3.bf16.msra.mxu0 %v1349_v19 }
 0x3ff   : > { %1351 = vmatprep.subr.bf16.mxu0 %v1493_v20 }
 0x400   : > { %v591_v29 = vsel %vm590_vm8, %v587_v9, %v589_v26  ;;  %v1352_v30 = vpack.c.bf16 %v713_v24, %v712_v27  ;;  %v1259_v31 = vpop.f32.mrb[8].mxu0 }
 0x401   : > { %v594_v32 = vsel %vm592_vm9, %v593_v28, %v591_v29  ;;  %v715_v33 = vmax.f32 %v1259_v31, 0.0  ;;  %v699_v34 = vpop.f32.mrb[9].mxu0 }
 0x402   : > { %597 = vst.msk [vmem:[%s1746_s4 + $0x1] sm:$0x1] %vm595_vm6, %v594_v32  ;;  %v714_v35 = vmax.f32 %v699_v34, 0.0  ;;  %1353 = vmatpush3.bf16.msra.mxu0 %v1352_v30 }
 0x403   : > { %1354 = vmatprep.subr.bf16.mxu0 %v1493_v20 }
 0x404   : > { %v1355_v36 = vpack.c.bf16 %v715_v33, %v714_v35 }
 0x406   : > { %1356 = vmatpush3.bf16.msra.mxu0 %v1355_v36 }
 0x407   : > { %1365 = vmatprep.subr.bf16.mxu0 %v1493_v20 }
 0x409   : > { %1277 = vmatmul.mubr.msk.f32.vlgmr.msra.gmra.mrb[10].mxu0 %vm326_vm2, %v1665_v42 }
 0x40a   : > { %1298 = vmatprep.mubr.msk.f32.mxu0 %vm1494_vm1, %v1495_v21 }
 0x40f   : > { %1368 = vmatpush3.bf16.xpose.msk.msra.mxu0 %vm1675_vm5, %v1366_v57 }
 0x410   : > { %1369 = vmatprep.subr.bf16.mxu0 %v1493_v20 }
 0x417   : > { %1372 = vmatpush3.bf16.xpose.msk.msra.mxu0 %vm1675_vm5, %v1370_v62 }
 0x4dc   : > { %v782_v37 = vpop.f32.mrb[10].mxu0 }
 0x4dd   : > { %v1278_v38 = vpop.f32.mrb[11].mxu0  ;;  %v786_v39 = vsel %vm400_vm3, %v782_v37, -inf }
 0x4de   : > { %787 = vmax.xlane.f32.xlu1 %v786_v39 }
 0x56b   : > { %v788_v21 = vpop.xlane.xlu1 %787 }
 0x56c   : > { %v789_v40 = vsub.f32 %v782_v37, %v788_v21 }
 0x56e   : > { %v790_v41 = vmul.f32 1.442695, %v789_v40 }
 0x570   : > { %1423 = vpow2.f32 %v790_v41 }
 0x57a   : > { %v1424_v42 = vpop.eup %1423 }
 0x57b   : > { %v792_v43 = vsel %vm400_vm3, %v1424_v42, 0.0 }
 0x57c   : > { %793 = vadd.xlane.f32.xlu1 %v792_v43 }
 0x609   : > { %v794_v20 = vpop.xlane.xlu1 %793 }
 0x60a   : > { %1425 = vrcp.f32 %v794_v20 }
 0x614   : > { %v1426_v44 = vpop.eup %1425 }
 0x615   : > { %v796_v45 = vmul.f32 %v1426_v44, %v1424_v42 }
 0x617   : > { %1288 = vmatmul.mubr.msk.f32.vlgmr.msra.gmra.mrb[12].mxu1 %vm412_vm4, %v796_v45  ;;  %1299 = vmatmul.mubr.msk.f32.vlgmr.msra.gmra.mrb[12].mxu0 %vm412_vm4, %v796_v45 }
 0x6ea   : > { %v878_v46 = vpop.f32.mrb[12].mxu1  ;;  %v964_v47 = vpop.f32.mrb[12].mxu0 }
 0x6eb   : > { %v968_v48 = vmul.f32 %v878_v46, %v878_v46  ;;  %1108 = vst.msk [vmem:[%s1746_s4 + $0x2] sm:$0x1] %vm595_vm6, %v878_v46  ;;  %v1289_v49 = vpop.f32.mrb[13].mxu1  ;;  %v1300_v50 = vpop.f32.mrb[13].mxu0 }
 0x6ed   : > { %v969_v51 = vsub.f32 %v964_v47, %v968_v48 }
 0x6ef   : > { %vm970_vm10 = vcmp.le.f32.partialorder %v969_v51, 1e-12 }
 0x6f0   : > { %v971_v52 = vsel %vm970_vm10, 1e-12, %v969_v51 }
 0x6f1   : > { %1427 = vrsqrt.f32 %v971_v52  ;;  %vm974_vm11 = vcmp.eq.f32.partialorder %v971_v52, inf  ;;  %v977_v55 = vand.u32 2147483648, %v971_v52  ;;  %vm976_vm12 = vcmp.eq.f32.partialorder %v971_v52, 0.0 }
 0x6fb   : > { %v1428_v53 = vpop.eup %1427 }
 0x6fc   : > { %v973_v54 = vmul.f32 %v1428_v53, %v971_v52 }
 0x6fe   : > { %v975_v56 = vsel %vm974_vm11, %v971_v52, %v973_v54 }
 0x6ff   : > { %v978_v57 = vsel %vm976_vm12, %v977_v55, %v975_v56 }
 0x700   : > { %1109 = vst.msk [vmem:[%s1746_s4 + $0x3] sm:$0x1] %vm595_vm6, %v978_v57 }
 0x701   : > { %1442 = shalt.err (!%p1439_p3)
}
 0x702   : > { %s1443_s20 = scalar_lea.hbm %s1784_s9, 64  ;;  %s1447_s26 = scalar_lea.hbm %s1834_s3, 128 }
 0x703   : > { %p1444_p4 = scmp.ne.s32.totalorder %s1784_s9, %s1443_s20  ;;  %p1448_p9 = scmp.lt.u32.totalorder %s1784_s9, %s1834_s3 }
 0x704   : > { %p1449_p10 = scmp.lt.u32.totalorder %s1447_s26, %s1443_s20  ;;  %p1451_p12 = scmp.lt.u32.totalorder %s1443_s20, %s1784_s9 }
 0x705   : > { %p1445_p7 = pnand %p1444_p4, %p1557_p5 }
 0x706   : > { %p1450_p11 = por %p1449_p10, %p1448_p9 }
 0x707   : > { %p1446_p8 = pneg %p1445_p7 }
 0x708   : > { %p1452_p13 = por %p1451_p12, %p1450_p11 }
 0x70a   : > { %p1453_p0 = pnand %p1452_p13, %p1446_p8 }
 0x70c   : > { %1456 = shalt.err (!%p1453_p0)
}
 0x70d   : > { %s1497_s29 = smov 32   ;;  %s1498_s30 = smov 2  }
 0x70e   : > { %1373 = dma.vmem_to_hbm [thread:$0]  (%p1557_p5), %s1779_s5, 64, %s1784_s9, %s1790_s16, %s1497_s29, %s1497_s29, %s1498_s30  }
 0x70f PF: > { %p1379_p1 = scmp.ge.s32.totalorder %s1491_s15, 2  ;;  %s1011_s4 = sand.u32 1, %s1479_s12  }
 0x710   : > { %s1012_s6 = scalar_lea.sflag [#allocation3], %s1011_s4 }
 0x711   : > { %p1376_p2 = pnand %p1379_p1, %p1561_p6 }
 0x713   : > { %1474 = dma.done.wait (!%p1376_p2), %s1012_s6, 64  }
 0x714   : > { %1476 = vsyncadd (!%p1376_p2), %s1012_s6, 4294967232  ;;  %p13_p3 = scmp.ge.s32.totalorder %s1544_s18, 4   ;;  %s1839_s12 = smov %s1483_s13 }
 0x715   : > { %s1840_s13 = smov %s1487_s14  ;;  %s1841_s14 = smov %s1555_s21 }
 0x716   : > { %s1842_s15 = smov %s1544_s18  ;;  %15 = sbr.rel (!%p13_p3) target bundleno = 3 (0x3), region = 69 }
 0x71d   :  { %1017 = vsyncpa [#allocation3], 1 }
 0x71e   :  { %1019 = vsyncpa [#allocation3 + $0x1], 1 }

</bundles_post_ra>
